<compile_context>
chip_gen: v7x
topology: tpu7x:2x2x1
jax: 0.10.0
libtpu: 0.0.40
codegen_flags: <defaults>
</compile_context>

<pallas_src>
import functools

import numpy as np
import jax
import jax.numpy as jnp
from jax.experimental import pallas as pl
from jax.experimental.pallas import tpu as pltpu


# ----------------------------------------------------------------------------
# Tiling / compiler-param helpers
# ----------------------------------------------------------------------------
_VMEM_LIMIT = 32 * 1024 * 1024      # scoped-VMEM cap, safe on v5e/v6e/v7x
_TILE_BUDGET = 16 * 1024 * 1024     # VMEM bytes one grid step may occupy
# TODO(synk): query pltpu.get_tpu_info() and raise the budget toward 64-100MiB
# on v5e/v6e (128 MiB physical VMEM) while keeping the v7x (64 MiB) headroom.


def _compiler_params():
    return pltpu.CompilerParams(
        dimension_semantics=("parallel",),
        vmem_limit_bytes=_VMEM_LIMIT,
    )


def _round_up(n, m):
    return (n + m - 1) // m * m


def _col_tile(m, per_col_bytes):
    """Pixel-axis tile: a multiple of 128 dividing m (m is already padded to a
    multiple of 128), sized from a VMEM budget, preferring >=2 grid steps so
    v7x's two TensorCores both get a shard."""
    cap = max(128, min(4096, (_TILE_BUDGET // max(per_col_bytes, 1)) // 128 * 128))
    t = min(m, cap)
    while m % t:
        t -= 128
    if t == m and m >= 256 and (m // 2) % 128 == 0:
        t = m // 2                      # give the second TensorCore a shard
    return t


def _row_block(n, per_row_bytes, budget=8 << 20):
    """Row block (batch*channel axis) for the upsample kernel: a divisor of n
    within the VMEM budget, preferring >=2 grid steps."""
    g = max(1, min(n, budget // max(per_row_bytes, 1)))
    while n % g:
        g -= 1
    if g == n and n > 1:
        g = next(d for d in range(n // 2, 0, -1) if n % d == 0)
    return g


# ----------------------------------------------------------------------------
# Fused kernel 1: stage stem (conv chain) + arbitrary projection branches.
#   stem   : layers applied to the input tile (emitted as bf16 raw feature)
#   branch : extra conv chains (+optional channel L2-normalize) applied to the
#            stem result, each emitted as its own f32 output -- so a backbone
#            stage and its head_q/pred (or head_k, or bare normalize) share one
#            HBM read of the input feature.
# ----------------------------------------------------------------------------
def _fused_chain_kernel(*refs, stem_relu, branch_specs, emit_stem):
    n_layers = len(stem_relu) + sum(len(r) for r, _ in branch_specs)
    x_ref = refs[0]
    w_refs = refs[1:1 + 2 * n_layers]
    out_refs = refs[1 + 2 * n_layers:]

    def layer(h, li, relu):
        wt = w_refs[2 * li][...]                               # bf16 (Cout, Cin)
        acc = jnp.dot(wt, h.astype(jnp.bfloat16),
                      preferred_element_type=jnp.float32)      # MXU, f32 acc
        acc = acc + w_refs[2 * li + 1][...]                    # f32 bias (VPU)
        return jnp.maximum(acc, 0.0) if relu else acc

    h = x_ref[...]
    li = 0
    for relu in stem_relu:
        h = layer(h, li, relu)
        li += 1

    oi = 0
    if emit_stem:
        out_refs[0][...] = h.astype(out_refs[0].dtype)         # bf16 raw feature
        oi = 1
    for relu_flags, l2norm in branch_specs:
        g = h
        for relu in relu_flags:
            g = layer(g, li, relu)
            li += 1
        if l2norm:
            # F.normalize(dim=channel): x * rsqrt(max(||x||^2, eps^2)), f32 math
            g = g.astype(jnp.float32)
            ss = jnp.sum(g * g, axis=0, keepdims=True)         # sublane reduce (XLU)
            g = g * jax.lax.rsqrt(jnp.maximum(ss, 1e-24))      # rsqrt -> EUP slot
        out_refs[oi][...] = g.astype(out_refs[oi].dtype)
        oi += 1


def fused_stage(x_cm, stem, branches, emit_stem=True,
                stem_dtype=jnp.bfloat16, branch_dtype=jnp.float32):
    """x_cm: (Cin, Mpad), Mpad % 128 == 0.
    stem: [(wt_bf16 (Cout,Cin), b_f32 (Cout,1), relu)], branches: [(layers, l2norm)].
    Returns [stem_out?] + [branch outs]."""
    cin, m = x_cm.shape
    all_layers = list(stem) + [lyr for layers, _ in branches for lyr in layers]
    c_stem = stem[-1][0].shape[0] if stem else cin

    out_chans, out_dtypes = [], []
    if emit_stem:
        out_chans.append(c_stem)
        out_dtypes.append(stem_dtype)
    for layers, _ in branches:
        out_chans.append(layers[-1][0].shape[0] if layers else c_stem)
        out_dtypes.append(branch_dtype)

    # rough per-column VMEM footprint: double-buffered input + outputs + f32 work
    per_col = 2 * cin * x_cm.dtype.itemsize
    per_col += 2 * sum(c * jnp.dtype(d).itemsize for c, d in zip(out_chans, out_dtypes))
    widest = max([cin, c_stem] + [w.shape[0] for w, _, _ in all_layers])
    per_col += 2 * widest * 4
    tm = _col_tile(m, per_col)

    in_specs = [pl.BlockSpec((cin, tm), lambda i: (0, i))]
    operands = [x_cm]
    for wt, b, _ in all_layers:
        in_specs.append(pl.BlockSpec(wt.shape, lambda i: (0, 0)))
        in_specs.append(pl.BlockSpec(b.shape, lambda i: (0, 0)))
        operands += [wt, b]

    out_shapes = [jax.ShapeDtypeStruct((c, m), d) for c, d in zip(out_chans, out_dtypes)]
    out_specs = [pl.BlockSpec((c, tm), lambda i: (0, i)) for c in out_chans]

    kernel = functools.partial(
        _fused_chain_kernel,
        stem_relu=tuple(bool(r) for _, _, r in stem),
        branch_specs=tuple((tuple(bool(r) for _, _, r in layers), bool(n))
                           for layers, n in branches),
        emit_stem=emit_stem)

    outs = pl.pallas_call(
        kernel,
        out_shape=out_shapes,
        grid=(m // tm,),
        in_specs=in_specs,
        out_specs=out_specs,
        compiler_params=_compiler_params(),
    )(*operands)
    return list(outs)


# ----------------------------------------------------------------------------
# Fused kernel 2: separable bilinear upsample (align_corners=False).
#   out[n] = Ah @ logits[n] @ Aw^T  as two small batched matmuls over a block
#   of the B*NC axis -- no dense Kronecker matrix.
# ----------------------------------------------------------------------------
def _separable_upsample_kernel(x_ref, awt_ref, ah_ref, o_ref):
    g, h4, w4 = x_ref.shape
    out_h = ah_ref.shape[0]
    out_w = awt_ref.shape[1]
    x = x_ref[...].astype(jnp.bfloat16)
    awt = jnp.broadcast_to(awt_ref[...][None], (g, w4, out_w))
    t = jnp.einsum('ghw,gwW->ghW', x, awt,
                   preferred_element_type=jnp.float32)          # W interpolation
    ah = jnp.broadcast_to(ah_ref[...][None], (g, out_h, h4))
    o_ref[...] = jnp.einsum('gHh,ghW->gHW', ah, t.astype(jnp.bfloat16),
                            preferred_element_type=jnp.float32)  # H interpolation


def _bilinear_matrix(out_size, in_size):
    """Row-interpolation matrix reproducing F.interpolate(bilinear, align_corners=False)."""
    a = np.zeros((out_size, in_size), dtype=np.float32)
    scale = in_size / out_size
    for d in range(out_size):
        src = max((d + 0.5) * scale - 0.5, 0.0)
        i0 = min(int(np.floor(src)), in_size - 1)
        i1 = min(i0 + 1, in_size - 1)
        lam = src - i0
        a[d, i0] += 1.0 - lam
        a[d, i1] += lam
    return a


@functools.lru_cache(maxsize=None)
def _bilinear_matrices(out_h, out_w, in_h, in_w):
    ah = _bilinear_matrix(out_h, in_h)                  # (H, h4)
    awt = _bilinear_matrix(out_w, in_w).T               # (w4, W)
    return jnp.asarray(ah, jnp.bfloat16), jnp.asarray(awt, jnp.bfloat16)


def bilinear_upsample(logits, out_hw):
    """logits: (N, h4, w4) -> (N, H, W) float32."""
    n, h4, w4 = logits.shape
    out_h, out_w = out_hw
    ah, awt = _bilinear_matrices(out_h, out_w, h4, w4)
    per_row = 2 * (h4 * w4 * logits.dtype.itemsize
                   + h4 * out_w * 4 + out_h * out_w * 4)
    g = _row_block(n, per_row)
    return pl.pallas_call(
        _separable_upsample_kernel,
        out_shape=jax.ShapeDtypeStruct((n, out_h, out_w), jnp.float32),
        grid=(n // g,),
        in_specs=[pl.BlockSpec((g, h4, w4), lambda i: (i, 0, 0)),
                  pl.BlockSpec((w4, out_w), lambda i: (0, 0)),
                  pl.BlockSpec((out_h, h4), lambda i: (0, 0))],
        out_specs=pl.BlockSpec((g, out_h, out_w), lambda i: (i, 0, 0)),
        compiler_params=_compiler_params(),
    )(logits, awt, ah)


# ----------------------------------------------------------------------------
# Layout glue (boundary only; pixel axis padded to a multiple of 128)
# ----------------------------------------------------------------------------
def nchw_to_cm(x):
    b, c, h, w = x.shape
    m = b * h * w
    f = jnp.transpose(x, (1, 0, 2, 3)).reshape(c, m)
    mp = _round_up(m, 128)
    if mp != m:
        f = jnp.pad(f, ((0, 0), (0, mp - m)))
    return f, (b, h, w)


def cm_to_nchw(f_cm, bhw):
    b, h, w = bhw
    c = f_cm.shape[0]
    return jnp.transpose(f_cm[:, :b * h * w].reshape(c, b, h, w), (1, 0, 2, 3))


def downsample_cm(f_cm, bhw):
    # TODO(synk): fold the stride-2 subsample into the producing stage kernel
    # (extra half-resolution out_spec) instead of this XLA strided slice; the
    # traffic is already halved by the bf16 feature dtype.
    b, h, w = bhw
    c = f_cm.shape[0]
    g = f_cm[:, :b * h * w].reshape(c, b, h, w)[:, :, ::2, ::2]
    h2, w2 = h // 2, w // 2
    m2 = b * h2 * w2
    g = g.reshape(c, m2)
    m2p = _round_up(m2, 128)
    if m2p != m2:
        g = jnp.pad(g, ((0, 0), (0, m2p - m2)))
    return g, (b, h2, w2)


# ----------------------------------------------------------------------------
# Synthetic module parameters (deterministic init; no checkpoint loading)
# TODO(synk): backbone / encoder_k / classifier / ContrastiveHead /
# PredictionHead are externally injected modules in the reference; they are
# stood in for by 1x1-conv stacks matching the documented channel interface.
# ----------------------------------------------------------------------------
FEAT_OUT_CHANNELS = [16, 32, 64, 128]   # scaled-down stand-in for [256, 512, 1024, 2048]
OUT_CHANNEL = 32                        # stand-in for out_channel = 128
NUM_CLASSES = 8
HIDDEN_CLS = 64
IN_CHANNELS = 3


def _make_linear(key, cin, cout):
    kw, kb = jax.random.split(key)
    # weights pre-cast to bf16 once (MXU operand dtype); biases stay f32
    wt = (jax.random.normal(kw, (cout, cin), jnp.float32) * (1.0 / np.sqrt(cin))
          ).astype(jnp.bfloat16)
    b = 0.01 * jax.random.normal(kb, (cout, 1), jnp.float32)
    return wt, b


def init_params(key):
    keys = iter(jax.random.split(key, 64))
    chans = [IN_CHANNELS] + FEAT_OUT_CHANNELS
    backbone = [_make_linear(next(keys), chans[i], chans[i + 1]) for i in range(4)]
    head_q = [(_make_linear(next(keys), c, OUT_CHANNEL),
               _make_linear(next(keys), OUT_CHANNEL, OUT_CHANNEL))
              for c in FEAT_OUT_CHANNELS]
    pred = [(_make_linear(next(keys), OUT_CHANNEL, OUT_CHANNEL),
             _make_linear(next(keys), OUT_CHANNEL, OUT_CHANNEL))
            for _ in range(4)]
    classifier = (_make_linear(next(keys), FEAT_OUT_CHANNELS[-1], HIDDEN_CLS),
                  _make_linear(next(keys), HIDDEN_CLS, NUM_CLASSES))
    # _init_encoder_k copies the backbone / head_q weights into the key branch.
    # Keep them as explicit independent copies (no fragile id()-aliasing); a
    # momentum update would later make them diverge, matching BYOL semantics.
    copy = lambda t: jax.tree_util.tree_map(jnp.array, t)
    return dict(backbone=backbone, encoder_k=copy(backbone), head_q=head_q,
                head_k=copy(head_q), pred=pred, classifier=classifier)


# ----------------------------------------------------------------------------
# Sub-module forwards: one fused pallas_call per backbone stage, which emits
# the raw (bf16) feature plus any head-projected / normalized outputs.
# ----------------------------------------------------------------------------
def backbone_forward(stages, x_cm, bhw, branch_fn=None):
    feats, branch_outs = [], []
    h, shape = x_cm, bhw
    for i, (wt, b) in enumerate(stages):
        if i > 0:
            h, shape = downsample_cm(h, shape)
        branches = branch_fn(i) if branch_fn is not None else []
        outs = fused_stage(h, stem=[(wt, b, True)], branches=branches, emit_stem=True)
        h = outs[0]
        feats.append((h, shape))
        branch_outs.append([(o, shape) for o in outs[1:]])
    return feats, branch_outs


def _q_branch(params, lvl):     # head_q -> pred -> normalize, fused
    (h1w, h1b), (h2w, h2b) = params["head_q"][lvl]
    (p1w, p1b), (p2w, p2b) = params["pred"][lvl]
    return ([(h1w, h1b, True), (h2w, h2b, False),
             (p1w, p1b, True), (p2w, p2b, False)], True)


def _k_branch(params, lvl):     # head_k -> normalize, fused
    (h1w, h1b), (h2w, h2b) = params["head_k"][lvl]
    return ([(h1w, h1b, True), (h2w, h2b, False)], True)


def _norm_branch(_lvl):         # bare channel L2-normalize, fused
    return ([], True)


def classifier_forward(params, x4_cm, bhw4, out_hw):
    # TODO(synk): the reference classifier consumes (x1, x2, x3, x4); the
    # stand-in uses x4 only (conv+ReLU+conv) to keep the interface.
    (w1, b1), (w2, b2) = params["classifier"]
    logits_cm = fused_stage(x4_cm, stem=[(w1, b1, True), (w2, b2, False)],
                            branches=[], emit_stem=True,
                            stem_dtype=jnp.bfloat16)[0]
    b, h4, w4 = bhw4
    nc = w2.shape[0]
    m4 = b * h4 * w4
    logits = jnp.transpose(logits_cm[:, :m4].reshape(nc, b, h4, w4), (1, 0, 2, 3))
    logits = logits.reshape(b * nc, h4, w4)
    up = bilinear_upsample(logits, out_hw)               # (B*NC, H, W) f32
    return up.reshape(b, nc, out_hw[0], out_hw[1])


# ----------------------------------------------------------------------------
# _SegmentationBYOLModel.forward equivalent
# ----------------------------------------------------------------------------
def segmentation_byol_forward(params, x, y=None, proj=False, dual=False,
                              train_head=False, similarity=False):
    """x, y: NCHW float32 (PyTorch convention)."""
    x_cm, x_bhw = nchw_to_cm(x)
    if y is not None:
        y_cm, y_bhw = nchw_to_cm(y)

    # NCHW conversion only at the output boundary (caller convention).
    to_nchw = lambda pairs: [cm_to_nchw(f, s) for f, s in pairs]
    first = lambda branch_outs: [bo[0] for bo in branch_outs]

    if train_head:
        _, bx = backbone_forward(params["backbone"], x_cm, x_bhw,
                                 lambda l: [_norm_branch(l)])
        _, by = backbone_forward(params["backbone"], y_cm, y_bhw,
                                 lambda l: [_norm_branch(l)])
        return to_nchw(first(bx)), to_nchw(first(by))

    if y is not None and not similarity:
        x_branch = lambda l: [_q_branch(params, l)]
    elif y is not None and similarity:
        x_branch = lambda l: [_norm_branch(l)]
    else:
        x_branch = None
    feats_x, bx = backbone_forward(params["backbone"], x_cm, x_bhw, x_branch)
    x1, s1 = feats_x[0]
    x4, s4 = feats_x[3]

    feat_q = feat_k = feat_q2 = feat_k2 = None
    if y is not None:
        if similarity:
            feat_q = to_nchw(first(bx))
            _, by = backbone_forward(params["backbone"], y_cm, y_bhw,
                                     lambda l: [_norm_branch(l)])
            feat_k = to_nchw(first(by))
        else:
            feat_q = to_nchw(first(bx))
            _, bky = backbone_forward(params["encoder_k"], y_cm, y_bhw,
                                      lambda l: [_k_branch(params, l)])
            feat_k = to_nchw(first(bky))
            if dual:
                _, bqy = backbone_forward(params["backbone"], y_cm, y_bhw,
                                          lambda l: [_q_branch(params, l)])
                feat_q2 = to_nchw(first(bqy))
                _, bkx = backbone_forward(params["encoder_k"], x_cm, x_bhw,
                                          lambda l: [_k_branch(params, l)])
                feat_k2 = to_nchw(first(bkx))

    output = classifier_forward(params, x4, s4, x.shape[-2:])

    if proj:
        return output, cm_to_nchw(x1, s1).astype(jnp.float32)
    if y is not None:
        if dual:
            return output, feat_q, feat_k, feat_q2, feat_k2
        return output, feat_q, feat_k
    return output


# ----------------------------------------------------------------------------
if __name__ == "__main__":
    key = jax.random.PRNGKey(0)
    kp, kx, ky = jax.random.split(key, 3)
    params = init_params(kp)

    x = jax.random.normal(kx, (2, IN_CHANNELS, 16, 16), jnp.float32)
    y = jax.random.normal(ky, (2, IN_CHANNELS, 16, 16), jnp.float32)

    # default branch: y provided, no flags -> (output, feat_q, feat_k)
    output, feat_q, feat_k = segmentation_byol_forward(params, x, y)
    jax.block_until_ready(output)
    for f in feat_q + feat_k:
        jax.block_until_ready(f)

    # also exercise the y=None branch
    out_only = segmentation_byol_forward(params, x)
    jax.block_until_ready(out_only)

    assert output.shape == (2, NUM_CLASSES, 16, 16)
    assert out_only.shape == (2, NUM_CLASSES, 16, 16)
    assert len(feat_q) == 4 and len(feat_k) == 4
    assert feat_q[0].shape == (2, OUT_CHANNEL, 16, 16)
    assert feat_k[3].shape == (2, OUT_CHANNEL, 2, 2)
    assert bool(jnp.all(jnp.isfinite(output)))
    # projected features are unit-norm along channels (normalize done in f32)
    norms = jnp.sqrt(jnp.sum(feat_q[0].astype(jnp.float32) ** 2, axis=1))
    assert bool(jnp.all(jnp.abs(norms - 1.0) < 1e-3))

    print("KERNEL_OK")
</pallas_src>

<mosaic_0001>
module attributes {stable_mosaic.version = 11 : i64} {
  func.func @_fused_chain_kernel(%arg0: i32, %arg1: memref<3x256xf32, #tpu.memory_space<vmem>>, %arg2: memref<16x3xbf16, #tpu.memory_space<vmem>>, %arg3: memref<16x1xf32, #tpu.memory_space<vmem>>, %arg4: memref<32x16xbf16, #tpu.memory_space<vmem>>, %arg5: memref<32x1xf32, #tpu.memory_space<vmem>>, %arg6: memref<32x32xbf16, #tpu.memory_space<vmem>>, %arg7: memref<32x1xf32, #tpu.memory_space<vmem>>, %arg8: memref<32x32xbf16, #tpu.memory_space<vmem>>, %arg9: memref<32x1xf32, #tpu.memory_space<vmem>>, %arg10: memref<32x32xbf16, #tpu.memory_space<vmem>>, %arg11: memref<32x1xf32, #tpu.memory_space<vmem>>, %arg12: memref<16x256xbf16, #tpu.memory_space<vmem>>, %arg13: memref<32x256xf32, #tpu.memory_space<vmem>>) attributes {dimension_semantics = [#tpu.dimension_semantics<parallel>], iteration_bounds = array<i64: 2>, scalar_prefetch = 0 : i64, scratch_operands = 0 : i64, tpu.core_type = #tpu.core_type<tc>, window_params = [{transform_indices = @transform_0, window_bounds = array<i64: 3, 256>}, {pipeline_mode = #tpu.pipeline_mode<synchronous>, transform_indices = @transform_1, window_bounds = array<i64: 16, 3>}, {pipeline_mode = #tpu.pipeline_mode<synchronous>, transform_indices = @transform_2, window_bounds = array<i64: 16, 1>}, {pipeline_mode = #tpu.pipeline_mode<synchronous>, transform_indices = @transform_3, window_bounds = array<i64: 32, 16>}, {pipeline_mode = #tpu.pipeline_mode<synchronous>, transform_indices = @transform_4, window_bounds = array<i64: 32, 1>}, {pipeline_mode = #tpu.pipeline_mode<synchronous>, transform_indices = @transform_5, window_bounds = array<i64: 32, 32>}, {pipeline_mode = #tpu.pipeline_mode<synchronous>, transform_indices = @transform_6, window_bounds = array<i64: 32, 1>}, {pipeline_mode = #tpu.pipeline_mode<synchronous>, transform_indices = @transform_7, window_bounds = array<i64: 32, 32>}, {pipeline_mode = #tpu.pipeline_mode<synchronous>, transform_indices = @transform_8, window_bounds = array<i64: 32, 1>}, {pipeline_mode = #tpu.pipeline_mode<synchronous>, transform_indices = @transform_9, window_bounds = array<i64: 32, 32>}, {pipeline_mode = #tpu.pipeline_mode<synchronous>, transform_indices = @transform_10, window_bounds = array<i64: 32, 1>}, {transform_indices = @transform_11, window_bounds = array<i64: 16, 256>}, {transform_indices = @transform_12, window_bounds = array<i64: 32, 256>}]} {
    %c0 = arith.constant 0 : index
    %c0_0 = arith.constant 0 : index
    %0 = vector.load %arg1[%c0, %c0_0] : memref<3x256xf32, #tpu.memory_space<vmem>>, vector<3x256xf32>
    %c0_1 = arith.constant 0 : index
    %c0_2 = arith.constant 0 : index
    %1 = vector.load %arg2[%c0_1, %c0_2] : memref<16x3xbf16, #tpu.memory_space<vmem>>, vector<16x3xbf16>
    %2 = arith.truncf %0 : vector<3x256xf32> to vector<3x256xbf16>
    %cst = arith.constant dense<0.000000e+00> : vector<16x256xf32>
    %3 = tpu.matmul %1, %2, %cst {dimension_numbers = #tpu.dot_dimension_numbers<[1], [0], [0], [1], [0, 0, 1, 1], [], []>} : vector<16x3xbf16>, vector<3x256xbf16>, vector<16x256xf32> -> vector<16x256xf32>
    %c0_3 = arith.constant 0 : index
    %c0_4 = arith.constant 0 : index
    %4 = vector.load %arg3[%c0_3, %c0_4] : memref<16x1xf32, #tpu.memory_space<vmem>>, vector<16x1xf32>
    %5 = vector.broadcast %4 : vector<16x1xf32> to vector<16x256xf32>
    %6 = arith.addf %3, %5 : vector<16x256xf32>
    %cst_5 = arith.constant 0.000000e+00 : f32
    %7 = vector.broadcast %cst_5 : f32 to vector<16x256xf32>
    %8 = arith.maximumf %6, %7 : vector<16x256xf32>
    %9 = arith.truncf %8 : vector<16x256xf32> to vector<16x256xbf16>
    %c0_6 = arith.constant 0 : index
    %c0_7 = arith.constant 0 : index
    %10 = vector.load %arg12[%c0_6, %c0_7] : memref<16x256xbf16, #tpu.memory_space<vmem>>, vector<16x256xbf16>
    tpu.vector_store %arg12[%c0_6, %c0_7], %9 {strides = array<i32>} : memref<16x256xbf16, #tpu.memory_space<vmem>>, vector<16x256xbf16>,
    %c0_8 = arith.constant 0 : index
    %c0_9 = arith.constant 0 : index
    %11 = vector.load %arg4[%c0_8, %c0_9] : memref<32x16xbf16, #tpu.memory_space<vmem>>, vector<32x16xbf16>
    %12 = arith.truncf %8 : vector<16x256xf32> to vector<16x256xbf16>
    %cst_10 = arith.constant dense<0.000000e+00> : vector<32x256xf32>
    %13 = tpu.matmul %11, %12, %cst_10 {dimension_numbers = #tpu.dot_dimension_numbers<[1], [0], [0], [1], [0, 0, 1, 1], [], []>} : vector<32x16xbf16>, vector<16x256xbf16>, vector<32x256xf32> -> vector<32x256xf32>
    %c0_11 = arith.constant 0 : index
    %c0_12 = arith.constant 0 : index
    %14 = vector.load %arg5[%c0_11, %c0_12] : memref<32x1xf32, #tpu.memory_space<vmem>>, vector<32x1xf32>
    %15 = vector.broadcast %14 : vector<32x1xf32> to vector<32x256xf32>
    %16 = arith.addf %13, %15 : vector<32x256xf32>
    %cst_13 = arith.constant 0.000000e+00 : f32
    %17 = vector.broadcast %cst_13 : f32 to vector<32x256xf32>
    %18 = arith.maximumf %16, %17 : vector<32x256xf32>
    %c0_14 = arith.constant 0 : index
    %c0_15 = arith.constant 0 : index
    %19 = vector.load %arg6[%c0_14, %c0_15] : memref<32x32xbf16, #tpu.memory_space<vmem>>, vector<32x32xbf16>
    %20 = arith.truncf %18 : vector<32x256xf32> to vector<32x256xbf16>
    %cst_16 = arith.constant dense<0.000000e+00> : vector<32x256xf32>
    %21 = tpu.matmul %19, %20, %cst_16 {dimension_numbers = #tpu.dot_dimension_numbers<[1], [0], [0], [1], [0, 0, 1, 1], [], []>} : vector<32x32xbf16>, vector<32x256xbf16>, vector<32x256xf32> -> vector<32x256xf32>
    %c0_17 = arith.constant 0 : index
    %c0_18 = arith.constant 0 : index
    %22 = vector.load %arg7[%c0_17, %c0_18] : memref<32x1xf32, #tpu.memory_space<vmem>>, vector<32x1xf32>
    %23 = vector.broadcast %22 : vector<32x1xf32> to vector<32x256xf32>
    %24 = arith.addf %21, %23 : vector<32x256xf32>
    %c0_19 = arith.constant 0 : index
    %c0_20 = arith.constant 0 : index
    %25 = vector.load %arg8[%c0_19, %c0_20] : memref<32x32xbf16, #tpu.memory_space<vmem>>, vector<32x32xbf16>
    %26 = arith.truncf %24 : vector<32x256xf32> to vector<32x256xbf16>
    %cst_21 = arith.constant dense<0.000000e+00> : vector<32x256xf32>
    %27 = tpu.matmul %25, %26, %cst_21 {dimension_numbers = #tpu.dot_dimension_numbers<[1], [0], [0], [1], [0, 0, 1, 1], [], []>} : vector<32x32xbf16>, vector<32x256xbf16>, vector<32x256xf32> -> vector<32x256xf32>
    %c0_22 = arith.constant 0 : index
    %c0_23 = arith.constant 0 : index
    %28 = vector.load %arg9[%c0_22, %c0_23] : memref<32x1xf32, #tpu.memory_space<vmem>>, vector<32x1xf32>
    %29 = vector.broadcast %28 : vector<32x1xf32> to vector<32x256xf32>
    %30 = arith.addf %27, %29 : vector<32x256xf32>
    %cst_24 = arith.constant 0.000000e+00 : f32
    %31 = vector.broadcast %cst_24 : f32 to vector<32x256xf32>
    %32 = arith.maximumf %30, %31 : vector<32x256xf32>
    %c0_25 = arith.constant 0 : index
    %c0_26 = arith.constant 0 : index
    %33 = vector.load %arg10[%c0_25, %c0_26] : memref<32x32xbf16, #tpu.memory_space<vmem>>, vector<32x32xbf16>
    %34 = arith.truncf %32 : vector<32x256xf32> to vector<32x256xbf16>
    %cst_27 = arith.constant dense<0.000000e+00> : vector<32x256xf32>
    %35 = tpu.matmul %33, %34, %cst_27 {dimension_numbers = #tpu.dot_dimension_numbers<[1], [0], [0], [1], [0, 0, 1, 1], [], []>} : vector<32x32xbf16>, vector<32x256xbf16>, vector<32x256xf32> -> vector<32x256xf32>
    %c0_28 = arith.constant 0 : index
    %c0_29 = arith.constant 0 : index
    %36 = vector.load %arg11[%c0_28, %c0_29] : memref<32x1xf32, #tpu.memory_space<vmem>>, vector<32x1xf32>
    %37 = vector.broadcast %36 : vector<32x1xf32> to vector<32x256xf32>
    %38 = arith.addf %35, %37 : vector<32x256xf32>
    %39 = arith.mulf %38, %38 : vector<32x256xf32>
    %cst_30 = arith.constant dense<0.000000e+00> : vector<256xf32>
    %40 = vector.multi_reduction <add>, %39, %cst_30 [0] : vector<32x256xf32> to vector<256xf32>
    %41 = vector.shape_cast %40 : vector<256xf32> to vector<1x256xf32>
    %cst_31 = arith.constant 1.000000e-24 : f32
    %42 = vector.broadcast %cst_31 : f32 to vector<1x256xf32>
    %43 = arith.maximumf %41, %42 : vector<1x256xf32>
    %44 = math.rsqrt %43 : vector<1x256xf32>
    %45 = vector.broadcast %44 : vector<1x256xf32> to vector<32x256xf32>
    %46 = arith.mulf %38, %45 : vector<32x256xf32>
    %c0_32 = arith.constant 0 : index
    %c0_33 = arith.constant 0 : index
    %47 = vector.load %arg13[%c0_32, %c0_33] : memref<32x256xf32, #tpu.memory_space<vmem>>, vector<32x256xf32>
    tpu.vector_store %arg13[%c0_32, %c0_33], %46 {strides = array<i32>} : memref<32x256xf32, #tpu.memory_space<vmem>>, vector<32x256xf32>,
    return
  }
  func.func @transform_0(%arg0: i32) -> (i32, i32) {
    %c0_i32 = arith.constant 0 : i32
    %c0_i32_0 = arith.constant 0 : i32
    return %c0_i32, %arg0 : i32, i32
  }
  func.func @transform_1(%arg0: i32) -> (i32, i32) {
    %c0_i32 = arith.constant 0 : i32
    %c0_i32_0 = arith.constant 0 : i32
    %c0_i32_1 = arith.constant 0 : i32
    return %c0_i32, %c0_i32_0 : i32, i32
  }
  func.func @transform_2(%arg0: i32) -> (i32, i32) {
    %c0_i32 = arith.constant 0 : i32
    %c0_i32_0 = arith.constant 0 : i32
    %c0_i32_1 = arith.constant 0 : i32
    return %c0_i32, %c0_i32_0 : i32, i32
  }
  func.func @transform_3(%arg0: i32) -> (i32, i32) {
    %c0_i32 = arith.constant 0 : i32
    %c0_i32_0 = arith.constant 0 : i32
    %c0_i32_1 = arith.constant 0 : i32
    return %c0_i32, %c0_i32_0 : i32, i32
  }
  func.func @transform_4(%arg0: i32) -> (i32, i32) {
    %c0_i32 = arith.constant 0 : i32
    %c0_i32_0 = arith.constant 0 : i32
    %c0_i32_1 = arith.constant 0 : i32
    return %c0_i32, %c0_i32_0 : i32, i32
  }
  func.func @transform_5(%arg0: i32) -> (i32, i32) {
    %c0_i32 = arith.constant 0 : i32
    %c0_i32_0 = arith.constant 0 : i32
    %c0_i32_1 = arith.constant 0 : i32
    return %c0_i32, %c0_i32_0 : i32, i32
  }
  func.func @transform_6(%arg0: i32) -> (i32, i32) {
    %c0_i32 = arith.constant 0 : i32
    %c0_i32_0 = arith.constant 0 : i32
    %c0_i32_1 = arith.constant 0 : i32
    return %c0_i32, %c0_i32_0 : i32, i32
  }
  func.func @transform_7(%arg0: i32) -> (i32, i32) {
    %c0_i32 = arith.constant 0 : i32
    %c0_i32_0 = arith.constant 0 : i32
    %c0_i32_1 = arith.constant 0 : i32
    return %c0_i32, %c0_i32_0 : i32, i32
  }
  func.func @transform_8(%arg0: i32) -> (i32, i32) {
    %c0_i32 = arith.constant 0 : i32
    %c0_i32_0 = arith.constant 0 : i32
    %c0_i32_1 = arith.constant 0 : i32
    return %c0_i32, %c0_i32_0 : i32, i32
  }
  func.func @transform_9(%arg0: i32) -> (i32, i32) {
    %c0_i32 = arith.constant 0 : i32
    %c0_i32_0 = arith.constant 0 : i32
    %c0_i32_1 = arith.constant 0 : i32
    return %c0_i32, %c0_i32_0 : i32, i32
  }
  func.func @transform_10(%arg0: i32) -> (i32, i32) {
    %c0_i32 = arith.constant 0 : i32
    %c0_i32_0 = arith.constant 0 : i32
    %c0_i32_1 = arith.constant 0 : i32
    return %c0_i32, %c0_i32_0 : i32, i32
  }
  func.func @transform_11(%arg0: i32) -> (i32, i32) {
    %c0_i32 = arith.constant 0 : i32
    %c0_i32_0 = arith.constant 0 : i32
    return %c0_i32, %arg0 : i32, i32
  }
  func.func @transform_12(%arg0: i32) -> (i32, i32) {
    %c0_i32 = arith.constant 0 : i32
    %c0_i32_0 = arith.constant 0 : i32
    return %c0_i32, %arg0 : i32, i32
  }
}

</mosaic_0001>

<bundles_post_ra>
// kernel: tpu_custom_call.1
= control target key start
LH: loop header
LB: loop body
LE: loop exit
PB: predicated region body
PF: predicated region fallthrough
CT: control target
= control target key end

     0   :  { %s1641_s0 = inlined_call_operand.vmem [shape: f32[3,512], index: 0, kind: input, shape index: {}]   ;;  %s1642_s1 = inlined_call_operand.vmem [shape: bf16[16,3], index: 1, kind: input, shape index: {}]   ;;  %s1643_s2 = inlined_call_operand.vmem [shape: f32[16,1], index: 2, kind: input, shape index: {}]   ;;  %s1644_s3 = inlined_call_operand.vmem [shape: bf16[32,16], index: 3, kind: input, shape index: {}]   ;;  %s1645_s4 = inlined_call_operand.vmem [shape: f32[32,1], index: 4, kind: input, shape index: {}]   ;;  %s1646_s5 = inlined_call_operand.vmem [shape: bf16[32,32], index: 5, kind: input, shape index: {}]   ;;  %s1647_s6 = inlined_call_operand.vmem [shape: f32[32,1], index: 6, kind: input, shape index: {}]   ;;  %s1648_s7 = inlined_call_operand.vmem [shape: bf16[32,32], index: 7, kind: input, shape index: {}]   ;;  %s1649_s8 = inlined_call_operand.vmem [shape: f32[32,1], index: 8, kind: input, shape index: {}]   ;;  %s1650_s9 = inlined_call_operand.vmem [shape: bf16[32,32], index: 9, kind: input, shape index: {}]   ;;  %s1651_s10 = inlined_call_operand.vmem [shape: f32[32,1], index: 10, kind: input, shape index: {}]   ;;  %s1652_s11 = inlined_call_operand.hbm [shape: bf16[16,512], index: 11, kind: output, shape index: {0}]   ;;  %s1653_s12 = inlined_call_operand.hbm [shape: f32[32,512], index: 12, kind: output, shape index: {1}]  }
   0x1   :  { %1655 = sst [smem:[#allocation10_spill]] %s1641_s0 }
   0x2   :  { %18 = vsyncpa [#allocation3], 0 }
   0x3   :  { %20 = vsyncpa [#allocation3 + $0x1], 0 }
   0x4   :  { %21 = vsyncpa [#allocation5], 0 }
   0x5   :  { %23 = vsyncpa [#allocation5 + $0x1], 0  ;;  %s1398_s21 = smov 0   ;;  %s1400_s22 = smov 0  }
   0x6   :  { %s1402_s23 = smov 0   ;;  %s1404_s24 = smov 0  }
   0x7 LB: > { %1656 = sst [smem:[#allocation8_spill]] %s1318_s23  ;;  %s1419_s25 = sadd.s32 4294967295, %s1322_s24   ;;  %s1322_s24 = sphi %s1404_s24, %s1666_s24   ;;  %s1318_s23 = sphi %s1402_s23, %s1663_s23   ;;  %s1314_s22 = sphi %s1400_s22, %s1665_s22   ;;  %s1310_s21 = sphi %s1398_s21, %s1664_s21  }
   0x8   : > { %s1121_s26 = sadd.s32 4294967294, %s1322_s24   ;;  %s1423_s27 = sadd.s32 1, %s1322_s24  }
   0x9   : > { %s272_s28 = sadd.s32 1, %s1318_s23  ;;  %s269_s29 = ssub.s32 %s1322_s24, %s1423_s27 }
   0xa   : > { %p282_p0 = scmp.ne.s32.totalorder %s1318_s23, %s1314_s22  ;;  %p270_p1 = scmp.eq.s32.totalorder %s269_s29, 0 }
   0xb   : > { %p283_p2 = scmp.eq.s32.totalorder %s1419_s25, 1  ;;  %p288_p3 = scmp.ne.s32.totalorder %s1314_s22, %s1310_s21 }
   0xc   : > { %p289_p4 = scmp.eq.s32.totalorder %s1121_s26, 1  ;;  %p1124_p7 = scmp.ge.s32.totalorder %s1322_s24, 1 }
   0xd   : > { %s1434_s30 = scalar_select %p270_p1, %s1318_s23, %s272_s28  }
   0xe   : > { %p1436_p5 = por %p283_p2, %p282_p0  ;;  %p1440_p6 = por %p289_p4, %p288_p3 }
   0xf   : > { %1657 = sst [smem:[#allocation9_spill]] %s1434_s30  ;;  %p372_p8 = scmp.lt.s32.totalorder %s1322_s24, 3 }
  0x11   : > { %p373_p9 = pnand %p1124_p7, %p372_p8 }
  0x12   : > { %s1127_s15 = sshll.u32 (!%p373_p9), %s1419_s25, 1  ;;  %vm457_vm0 = vcmask (!%p373_p9), 1040384   ;;  %v1324_v0 = vmov (!%p373_p9), 0   ;;  %vm458_vm1 = vcmask (!%p373_p9), 1041408   ;;  %v1325_v1 = vmov (!%p373_p9), 65535   ;;  %v436_v3 = vld [vmem:[%s1643_s2] sm:$0xff] (!%p373_p9) }
  0x13   : > { %376 = sbr.rel (%p373_p9) target bundleno = 1235 (0x4d3), region = 64  ;;  %p420_p10 = scmp.lt.s32.totalorder (!%p373_p9), %s1127_s15, 3  ;;  %499 = vmatprep.mubr.bf16.mxu0 (!%p373_p9), %v1324_v0  ;;  %1212 = vset.pattern.permute.xlu0 (!%p373_p9), %v1324_v0  ;;  %v459_v2 = vsel (!%p373_p9), %vm457_vm0, 4294967295, %v1325_v1  ;;  %v437_v4 = vld [vmem:[%s1643_s2 + $0x8] sm:$0xff] (!%p373_p9)  ;;  %v534_v6 = vld [vmem:[%s1645_s4 + $0x10] sm:$0xff] (!%p373_p9)  ;;  %v642_v13 = vld [vmem:[%s1647_s6] sm:$0xff] (!%p373_p9) }
  0x14   : > { %605 = vmatprep.mubr.bf16.mxu1 (!%p373_p9), %v1324_v0  ;;  %1213 = vset.pattern.permute.xlu1 (!%p373_p9), %v1324_v0  ;;  %v460_v5 = vsel (!%p373_p9), %vm458_vm1, %v459_v2, 0  ;;  %s1660_s0 = sld [smem:[#allocation10_spill]] (!%p373_p9)  ;;  %v1215_v14 = vld [vmem:[%s1642_s1] sm:$0xff] (!%p373_p9)   ;;  %vm453_vm2 = vcmask (!%p373_p9), 23552   ;;  %v644_v15 = vld [vmem:[%s1647_s6 + $0x10] sm:$0xff] (!%p373_p9)  ;;  %v533_v21 = vld [vmem:[%s1645_s4 + $0x8] sm:$0xff] (!%p373_p9) }
  0x15   : > { %440 = vperm.xlu0 (!%p373_p9), %1212, %v436_v3   ;;  %v744_v16 = vld [vmem:[%s1649_s8] sm:$0xff] (!%p373_p9)  ;;  %v746_v17 = vld [vmem:[%s1649_s8 + $0x10] sm:$0xff] (!%p373_p9)  ;;  %v535_v22 = vld [vmem:[%s1645_s4 + $0x18] sm:$0xff] (!%p373_p9)  ;;  %vm566_vm3 = vcmask (!%p373_p9), 130048   ;;  %vm676_vm4 = vcmask (!%p373_p9), 261120  }
  0x16   : > { %v853_v18 = vld [vmem:[%s1651_s10] sm:$0xff] (!%p373_p9)  ;;  %v855_v19 = vld [vmem:[%s1651_s10 + $0x10] sm:$0xff] (!%p373_p9)  ;;  %v643_v23 = vld [vmem:[%s1647_s6 + $0x8] sm:$0xff] (!%p373_p9) }
  0x17   : > { %v532_v20 = vld [vmem:[%s1645_s4] sm:$0xff] (!%p373_p9)  ;;  %v645_v24 = vld [vmem:[%s1647_s6 + $0x18] sm:$0xff] (!%p373_p9)  ;;  %v745_v25 = vld [vmem:[%s1649_s8 + $0x8] sm:$0xff] (!%p373_p9) }
  0x18   : > { %538 = vperm.xlu1 (!%p373_p9), %1213, %v532_v20   ;;  %v747_v26 = vld [vmem:[%s1649_s8 + $0x18] sm:$0xff] (!%p373_p9)  ;;  %v854_v27 = vld [vmem:[%s1651_s10 + $0x8] sm:$0xff] (!%p373_p9)  ;;  %v1216_v47 = vld [vmem:[%s1644_s3] sm:$0xff] (!%p373_p9)  }
  0x19   : > { %445 = vperm.xlu0 (!%p373_p9), %1212, %v437_v4   ;;  %v856_v28 = vld [vmem:[%s1651_s10 + $0x18] sm:$0xff] (!%p373_p9)  ;;  %v1217_v48 = vld [vmem:[%s1644_s3 + $0x8] sm:$0xff] (!%p373_p9)  }
  0x1a   : > { %s1668_s15 = smov (!%p420_p10, %s1127_s15), 3 }
  0x1b   : > { %s1128_s20 = sshll.u32 %s1668_s15, 2 }
  0x1c   : > { %s423_s29 = scalar_lea.vmem %s1660_s0, %s1128_s20  ;;  %543 = vperm.xlu1 %1213, %v533_v21   ;;  %s1326_s20 = smov [#allocation2]  }
  0x1d   : > { %v428_v7 = vld [vmem:[%s423_s29] sm:$0x77]  ;;  %548 = vperm.xlu0 %1212, %v534_v6   ;;  %s1513_s29 = sand.u32 1, %s1314_s22   ;;  %s1232_s26 = sshll.u32 %s1326_s20, 4  ;;  %s1233_s26 = int_to_ptr.vmem [resolvable:$false] %s1232_s26 }
  0x1e   : > { %v432_v8 = vcombine.high %v428_v7, %v428_v7  ;;  %v434_v9 = vpack.c.bf16 %v428_v7, %v428_v7  ;;  %s1125_s16 = sshll.u32 %s1513_s29, 4 }
  0x1f   : > { %s1516_s17 = scalar_lea.vmem [#allocation2], %s1125_s16  ;;  %s1159_s16 = sshll.u32 %s1419_s25, 7 }
  0x20   : > { %v435_v10 = vpack.c.bf16 %v432_v8, %v432_v8  ;;  %v462_v11 = vand.u32 %v460_v5, %v434_v9  ;;  %553 = vperm.xlu1 %1213, %v535_v22   ;;  %s1011_s28 = sshll.u32 %s1516_s17, 4  ;;  %s1563_s23 = scalar_lea.hbm %s1652_s11, %s1159_s16  ;;  %s1557_s28 = int_to_ptr.vmem [resolvable:$true] %s1011_s28 }
  0x21   : > { %648 = vperm.xlu0 %1212, %v642_v13   ;;  %s1228_s19 = scalar_lea.vmem %s1557_s28, 256  ;;  %p1235_p0 = scmp.lt.s32.totalorder %s1557_s28, %s1233_s26 }
  0x22   : > { %v465_v12 = vand.u32 %v460_v5, %v435_v10  ;;  %p1229_p11 = scmp.ne.s32.totalorder %s1557_s28, %s1228_s19 }
  0x24   : > { %467 = vmatprep.subr.bf16.mxu0 %v465_v12  ;;  %653 = vperm.xlu1 %1213, %v643_v23   ;;  %p1230_p12 = pnand %p1229_p11, %p1436_p5 }
  0x25   : > { %468 = vmatpush1.bf16.msra.mxu0 %v462_v11  ;;  %658 = vperm.xlu0 %1212, %v644_v15  }
  0x26   : > { %p1231_p13 = pneg %p1230_p12 }
  0x28   : > { %1130 = vmatmul.mubr.msk.bf16.vlgmr.msra.gmra.mrb[0].mxu0 %vm453_vm2, %v1215_v14  ;;  %663 = vperm.xlu1 %1213, %v645_v24  }
  0x29   : > { %715 = vmatprep.mubr.bf16.mxu0 %v1324_v0  ;;  %750 = vperm.xlu0 %1212, %v744_v16  }
  0x2c   : > { %755 = vperm.xlu1 %1213, %v745_v25  }
  0x2d   : > { %760 = vperm.xlu0 %1212, %v746_v17  }
  0x30   : > { %765 = vperm.xlu1 %1213, %v747_v26  }
  0x31   : > { %859 = vperm.xlu0 %1212, %v853_v18   ;;  %v1218_v18 = vld [vmem:[%s1646_s5] sm:$0xff]  }
  0x34   : > { %864 = vperm.xlu1 %1213, %v854_v27  }
  0x35   : > { %869 = vperm.xlu0 %1212, %v855_v19   ;;  %v1219_v19 = vld [vmem:[%s1646_s5 + $0x8] sm:$0xff]  }
  0x38   : > { %874 = vperm.xlu1 %1213, %v856_v28  }
  0x94   : > { %v441_v29 = vpop.permute.xlu0 %440 }
  0x97   : > { %v539_v49 = vpop.permute.xlu1 %538 }
  0x98   : > { %v446_v33 = vpop.permute.xlu0 %445 }
  0x9b   : > { %v544_v53 = vpop.permute.xlu1 %543 }
  0x9c   : > { %v549_v1 = vpop.permute.xlu0 %548 }
  0x9f   : > { %v554_v6 = vpop.permute.xlu1 %553 }
  0xa0   : > { %v649_v21 = vpop.permute.xlu0 %648 }
  0xa3   : > { %v654_v23 = vpop.permute.xlu1 %653 }
  0xfb   : > { %v501_v30 = vpop.f32.mrb[0].mxu0 }
  0xfc   : > { %v502_v31 = vadd.f32 %v501_v30, %v441_v29  ;;  %v503_v32 = vpop.f32.mrb[1].mxu0 }
  0xfd   : > { %v504_v34 = vadd.f32 %v503_v32, %v441_v29  ;;  %v505_v35 = vpop.f32.mrb[2].mxu0 }
  0xfe   : > { %v510_v36 = vmax.f32 %v502_v31, 0.0  ;;  %v506_v37 = vadd.f32 %v505_v35, %v446_v33  ;;  %v507_v38 = vpop.f32.mrb[3].mxu0  ;;  %v664_v35 = vpop.permute.xlu1 %663 }
  0xff   : > { %v511_v39 = vmax.f32 %v504_v34, 0.0  ;;  %v508_v40 = vadd.f32 %v507_v38, %v446_v33  ;;  %v659_v33 = vpop.permute.xlu0 %658 }
 0x100   : > { %v512_v41 = vmax.f32 %v506_v37, 0.0 }
 0x101   : > { %v1157_v42 = vpack.c.bf16 %v511_v39, %v510_v36  ;;  %v513_v43 = vmax.f32 %v508_v40, 0.0 }
 0x102   : > { %v514_v44 = vpack.c.bf16 %v512_v41, %v510_v36 }
 0x103   : > { %526 = vst [vmem:[%s1516_s17] sm:$0xff] %v1157_v42  ;;  %v1158_v45 = vpack.c.bf16 %v513_v43, %v512_v41  ;;  %v515_v46 = vpack.c.bf16 %v513_v43, %v511_v39 }
 0x105   : > { %527 = vst [vmem:[%s1516_s17 + $0x8] sm:$0xff] %v1158_v45  ;;  %573 = vmatprep.subr.bf16.mxu1 %v515_v46  ;;  %v1221_v45 = vld [vmem:[%s1648_s7 + $0x8] sm:$0xff]   ;;  %v751_v46 = vpop.permute.xlu0 %750  ;;  %s1234_s17 = scalar_lea.vmem %s1233_s26, 512 }
 0x106   : > { %574 = vmatpush1.bf16.msra.mxu1 %v514_v44  ;;  %v1220_v44 = vld [vmem:[%s1648_s7] sm:$0xff]   ;;  %p1236_p1 = scmp.lt.s32.totalorder %s1234_s17, %s1228_s19 }
 0x108   : > { %p1237_p2 = por %p1236_p1, %p1235_p0 }
 0x109   : > { %1135 = vmatmul.mubr.msk.bf16.vlgmr.msra.gmra.mrb[0].mxu1 %vm566_vm3, %v1216_v47 }
 0x10a   : > { %615 = vmatprep.mubr.bf16.mxu1 %v1324_v0  ;;  %p1238_p3 = pnand %p1237_p2, %p1231_p13 }
 0x111   : > { %1136 = vmatmul.mubr.msk.bf16.gmra.mrb[4].mxu1 %vm566_vm3, %v1217_v48 }
 0x112   : > { %816 = vmatprep.mubr.bf16.mxu1 %v1324_v0 }
 0x1dc   : > { %v607_v50 = vpop.f32.mrb[0].mxu1 }
 0x1dd   : > { %v608_v51 = vadd.f32 %v607_v50, %v539_v49  ;;  %v609_v52 = vpop.f32.mrb[1].mxu1  ;;  %v756_v50 = vpop.permute.xlu1 %755 }
 0x1de   : > { %v610_v54 = vadd.f32 %v609_v52, %v539_v49  ;;  %v611_v55 = vpop.f32.mrb[2].mxu1 }
 0x1df   : > { %v612_v56 = vadd.f32 %v611_v55, %v544_v53  ;;  %v613_v57 = vpop.f32.mrb[3].mxu1  ;;  %v626_v59 = vmax.f32 %v608_v51, 0.0 }
 0x1e0   : > { %v614_v58 = vadd.f32 %v613_v57, %v544_v53  ;;  %v627_v61 = vmax.f32 %v610_v54, 0.0 }
 0x1e1   : > { %v628_v60 = vmax.f32 %v612_v56, 0.0 }
 0x1e2   : > { %v629_v62 = vmax.f32 %v614_v58, 0.0 }
 0x1e3   : > { %v638_v63 = vpack.c.bf16 %v628_v60, %v626_v59 }
 0x1e4   : > { %v639_v2 = vpack.c.bf16 %v629_v62, %v627_v61  ;;  %v617_v3 = vpop.f32.mrb[4].mxu1  ;;  %v761_v61 = vpop.permute.xlu0 %760 }
 0x1e5   : > { %v618_v4 = vadd.f32 %v617_v3, %v549_v1  ;;  %v619_v5 = vpop.f32.mrb[5].mxu1  ;;  %v766_v3 = vpop.permute.xlu1 %765 }
 0x1e6   : > { %v620_v7 = vadd.f32 %v619_v5, %v549_v1  ;;  %v621_v8 = vpop.f32.mrb[6].mxu1  ;;  %683 = vmatprep.subr.bf16.mxu0 %v639_v2 }
 0x1e7   : > { %v622_v9 = vadd.f32 %v621_v8, %v554_v6  ;;  %v623_v10 = vpop.f32.mrb[7].mxu1  ;;  %684 = vmatpush1.bf16.msra.mxu0 %v638_v63  ;;  %v630_v12 = vmax.f32 %v618_v4, 0.0 }
 0x1e8   : > { %v624_v11 = vadd.f32 %v623_v10, %v554_v6  ;;  %v631_v14 = vmax.f32 %v620_v7, 0.0 }
 0x1e9   : > { %v632_v13 = vmax.f32 %v622_v9, 0.0 }
 0x1ea   : > { %v633_v15 = vmax.f32 %v624_v11, 0.0 }
 0x1eb   : > { %v640_v16 = vpack.c.bf16 %v632_v13, %v630_v12 }
 0x1ec   : > { %v641_v17 = vpack.c.bf16 %v633_v15, %v631_v14  ;;  %v1222_v15 = vld [vmem:[%s1650_s9] sm:$0xff]  }
 0x1ee   : > { %685 = vmatprep.subr.bf16.mxu0 %v641_v17 }
 0x1ef   : > { %686 = vmatpush1.bf16.msra.mxu0 %v640_v16  ;;  %v1223_v16 = vld [vmem:[%s1650_s9 + $0x8] sm:$0xff]  }
 0x1f2   : > { %1139 = vmatmul.mubr.msk.bf16.vlgmr.msra.gmra.mrb[4].mxu0 %vm676_vm4, %v1218_v18 }
 0x1f3   : > { %725 = vmatprep.mubr.bf16.mxu0 %v1324_v0 }
 0x1fa   : > { %1140 = vmatmul.mubr.msk.bf16.gmra.mrb[8].mxu0 %vm676_vm4, %v1219_v19 }
 0x1fb   : > { %925 = vmatprep.mubr.bf16.mxu0 %v1324_v0 }
 0x2c5   : > { %v717_v20 = vpop.f32.mrb[4].mxu0 }
 0x2c6   : > { %v719_v22 = vpop.f32.mrb[5].mxu0  ;;  %v718_v25 = vadd.f32 %v717_v20, %v649_v21 }
 0x2c7   : > { %v721_v24 = vpop.f32.mrb[6].mxu0  ;;  %v720_v28 = vadd.f32 %v719_v22, %v649_v21 }
 0x2c8   : > { %v722_v26 = vadd.f32 %v721_v24, %v654_v23  ;;  %v723_v27 = vpop.f32.mrb[7].mxu0 }
 0x2c9   : > { %v724_v29 = vadd.f32 %v723_v27, %v654_v23 }
 0x2ca   : > { %v740_v30 = vpack.c.bf16 %v722_v26, %v718_v25 }
 0x2cb   : > { %v741_v31 = vpack.c.bf16 %v724_v29, %v720_v28 }
 0x2cd   : > { %v727_v32 = vpop.f32.mrb[8].mxu0  ;;  %784 = vmatprep.subr.bf16.mxu1 %v741_v31 }
 0x2ce   : > { %v729_v34 = vpop.f32.mrb[9].mxu0  ;;  %785 = vmatpush1.bf16.msra.mxu1 %v740_v30  ;;  %v728_v37 = vadd.f32 %v727_v32, %v659_v33 }
 0x2cf   : > { %v731_v36 = vpop.f32.mrb[10].mxu0  ;;  %v730_v40 = vadd.f32 %v729_v34, %v659_v33 }
 0x2d0   : > { %v732_v38 = vadd.f32 %v731_v36, %v664_v35  ;;  %v733_v39 = vpop.f32.mrb[11].mxu0 }
 0x2d1   : > { %v734_v41 = vadd.f32 %v733_v39, %v664_v35 }
 0x2d2   : > { %v742_v42 = vpack.c.bf16 %v732_v38, %v728_v37 }
 0x2d3   : > { %v743_v43 = vpack.c.bf16 %v734_v41, %v730_v40 }
 0x2d5   : > { %786 = vmatprep.subr.bf16.mxu1 %v743_v43 }
 0x2d6   : > { %787 = vmatpush1.bf16.msra.mxu1 %v742_v42 }
 0x2d9   : > { %1143 = vmatmul.mubr.msk.bf16.vlgmr.msra.gmra.mrb[8].mxu1 %vm676_vm4, %v1220_v44 }
 0x2da   : > { %826 = vmatprep.mubr.bf16.mxu1 %v1324_v0 }
 0x2e1   : > { %1144 = vmatmul.mubr.msk.bf16.gmra.mrb[12].mxu1 %vm676_vm4, %v1221_v45 }
 0x3ac   : > { %v818_v47 = vpop.f32.mrb[8].mxu1 }
 0x3ad   : > { %v819_v48 = vadd.f32 %v818_v47, %v751_v46  ;;  %v820_v49 = vpop.f32.mrb[9].mxu1 }
 0x3ae   : > { %v821_v51 = vadd.f32 %v820_v49, %v751_v46  ;;  %v822_v52 = vpop.f32.mrb[10].mxu1 }
 0x3af   : > { %v823_v53 = vadd.f32 %v822_v52, %v756_v50  ;;  %v824_v54 = vpop.f32.mrb[11].mxu1  ;;  %v837_v56 = vmax.f32 %v819_v48, 0.0 }
 0x3b0   : > { %v825_v55 = vadd.f32 %v824_v54, %v756_v50  ;;  %v838_v58 = vmax.f32 %v821_v51, 0.0 }
 0x3b1   : > { %v839_v57 = vmax.f32 %v823_v53, 0.0 }
 0x3b2   : > { %v840_v59 = vmax.f32 %v825_v55, 0.0 }
 0x3b3   : > { %v849_v60 = vpack.c.bf16 %v839_v57, %v837_v56 }
 0x3b4   : > { %v850_v62 = vpack.c.bf16 %v840_v59, %v838_v58  ;;  %v828_v63 = vpop.f32.mrb[12].mxu1 }
 0x3b5   : > { %v829_v1 = vadd.f32 %v828_v63, %v761_v61  ;;  %v830_v2 = vpop.f32.mrb[13].mxu1 }
 0x3b6   : > { %v831_v4 = vadd.f32 %v830_v2, %v761_v61  ;;  %v832_v5 = vpop.f32.mrb[14].mxu1  ;;  %893 = vmatprep.subr.bf16.mxu0 %v850_v62 }
 0x3b7   : > { %v833_v6 = vadd.f32 %v832_v5, %v766_v3  ;;  %v834_v7 = vpop.f32.mrb[15].mxu1  ;;  %894 = vmatpush1.bf16.msra.mxu0 %v849_v60  ;;  %v841_v9 = vmax.f32 %v829_v1, 0.0 }
 0x3b8   : > { %v835_v8 = vadd.f32 %v834_v7, %v766_v3  ;;  %v842_v11 = vmax.f32 %v831_v4, 0.0 }
 0x3b9   : > { %v843_v10 = vmax.f32 %v833_v6, 0.0 }
 0x3ba   : > { %v844_v12 = vmax.f32 %v835_v8, 0.0 }
 0x3bb   : > { %v851_v13 = vpack.c.bf16 %v843_v10, %v841_v9 }
 0x3bc   : > { %v852_v14 = vpack.c.bf16 %v844_v12, %v842_v11 }
 0x3be   : > { %895 = vmatprep.subr.bf16.mxu0 %v852_v14 }
 0x3bf   : > { %896 = vmatpush1.bf16.msra.mxu0 %v851_v13 }
 0x3c2   : > { %1147 = vmatmul.mubr.msk.bf16.vlgmr.msra.gmra.mrb[12].mxu0 %vm676_vm4, %v1222_v15 }
 0x3c3   : > { %935 = vmatprep.mubr.bf16.mxu0 %v1324_v0 }
 0x3ca   : > { %1148 = vmatmul.mubr.msk.bf16.gmra.mrb[16].mxu0 %vm676_vm4, %v1223_v16 }
 0x3cb   : > { %1241 = shalt.err (!%p1238_p3)
}
 0x3cc   : > { %s1242_s16 = scalar_lea.hbm %s1563_s23, 256  ;;  %s1246_s20 = scalar_lea.hbm %s1652_s11, 512 }
 0x3cd   : > { %p1243_p4 = scmp.ne.s32.totalorder %s1563_s23, %s1242_s16  ;;  %p1247_p9 = scmp.lt.u32.totalorder %s1563_s23, %s1652_s11 }
 0x3ce   : > { %p1248_p10 = scmp.lt.u32.totalorder %s1246_s20, %s1242_s16  ;;  %p1250_p12 = scmp.lt.u32.totalorder %s1242_s16, %s1563_s23 }
 0x3cf   : > { %p1244_p7 = pnand %p1243_p4, %p1436_p5 }
 0x3d0   : > { %p1249_p11 = por %p1248_p10, %p1247_p9 }
 0x3d1   : > { %p1245_p8 = pneg %p1244_p7 }
 0x3d2   : > { %p1251_p13 = por %p1250_p12, %p1249_p11 }
 0x3d4   : > { %p1252_p0 = pnand %p1251_p13, %p1245_p8 }
 0x3d6   : > { %1255 = shalt.err (!%p1252_p0)
}
 0x3d7   : > { %s1327_s19 = smov 128   ;;  %s1328_s17 = smov 256   ;;  %v860_v0 = vpop.permute.xlu0 %859  ;;  %v865_v20 = vpop.permute.xlu1 %864 }
 0x3d8   : > { %s1329_s0 = smov 8   ;;  %s1661_s15 = scalar_lea.sflag [#allocation3], %s1513_s29 }
 0x3d9   : > { %1161 = dma.vmem_to_hbm [thread:$0]  (%p1436_p5), %s1557_s28, 256, %s1563_s23, %s1661_s15, %s1327_s19, %s1328_s17, %s1329_s0  }
 0x3da   : > { %s1126_s0 = sshll.u32 %s1513_s29, 6  ;;  %s1160_s30 = sshll.u32 %s1419_s25, 8 }
 0x3db   : > { %v870_v31 = vpop.permute.xlu0 %869  ;;  %v875_v36 = vpop.permute.xlu1 %874  ;;  %s418_s28 = scalar_lea.vmem [#allocation4], %s1126_s0  ;;  %s1597_s20 = scalar_lea.hbm %s1653_s12, %s1160_s30 }
 0x3dc   : > { %s1027_s23 = sshll.u32 %s418_s28, 4  ;;  %s998_s25 = scalar_lea.sflag [#allocation5], %s1513_s29  ;;  %s1592_s23 = int_to_ptr.vmem [resolvable:$true] %s1027_s23 }
 0x3dd   : > { %s1256_s26 = scalar_lea.vmem %s1592_s23, 1024  ;;  %s1330_s19 = smov [#allocation4]  }
 0x3de   : > { %p1257_p1 = scmp.ne.s32.totalorder %s1592_s23, %s1256_s26  ;;  %s1260_s15 = sshll.u32 %s1330_s19, 4  ;;  %s1261_s15 = int_to_ptr.vmem [resolvable:$false] %s1260_s15 }
 0x3df   : > { %s1262_s0 = scalar_lea.vmem %s1261_s15, 2048  ;;  %p1263_p4 = scmp.lt.s32.totalorder %s1592_s23, %s1261_s15 }
 0x3e0   : > { %p1258_p2 = pnand %p1257_p1, %p1436_p5  ;;  %p1264_p7 = scmp.lt.s32.totalorder %s1262_s0, %s1256_s26 }
 0x3e2   : > { %p1259_p3 = pneg %p1258_p2  ;;  %p1265_p8 = por %p1264_p7, %p1263_p4 }
 0x3e4   : > { %p1266_p9 = pnand %p1265_p8, %p1259_p3 }
 0x495   : > { %v927_v17 = vpop.f32.mrb[12].mxu0 }
 0x496   : > { %v928_v18 = vadd.f32 %v927_v17, %v860_v0  ;;  %v929_v19 = vpop.f32.mrb[13].mxu0 }
 0x497   : > { %v930_v21 = vadd.f32 %v929_v19, %v860_v0  ;;  %v931_v22 = vpop.f32.mrb[14].mxu0 }
 0x498   : > { %v932_v23 = vadd.f32 %v931_v22, %v865_v20  ;;  %v933_v24 = vpop.f32.mrb[15].mxu0  ;;  %v946_v26 = vmul.f32 %v928_v18, %v928_v18 }
 0x499   : > { %v934_v25 = vadd.f32 %v933_v24, %v865_v20  ;;  %v947_v28 = vmul.f32 %v930_v21, %v930_v21 }
 0x49a   : > { %v948_v27 = vmul.f32 %v932_v23, %v932_v23 }
 0x49b   : > { %v949_v29 = vmul.f32 %v934_v25, %v934_v25 }
 0x49c   : > { %v954_v30 = vadd.f32 %v948_v27, %v946_v26 }
 0x49d   : > { %v963_v32 = vadd.f32 %v949_v29, %v947_v28  ;;  %v937_v33 = vpop.f32.mrb[16].mxu0 }
 0x49e   : > { %v938_v34 = vadd.f32 %v937_v33, %v870_v31  ;;  %v939_v35 = vpop.f32.mrb[17].mxu0 }
 0x49f   : > { %v940_v37 = vadd.f32 %v939_v35, %v870_v31  ;;  %v941_v38 = vpop.f32.mrb[18].mxu0 }
 0x4a0   : > { %v950_v39 = vmul.f32 %v938_v34, %v938_v34  ;;  %v942_v40 = vadd.f32 %v941_v38, %v875_v36  ;;  %v943_v41 = vpop.f32.mrb[19].mxu0 }
 0x4a1   : > { %v951_v42 = vmul.f32 %v940_v37, %v940_v37  ;;  %v944_v43 = vadd.f32 %v943_v41, %v875_v36 }
 0x4a2   : > { %v955_v44 = vadd.f32 %v954_v30, %v950_v39  ;;  %v952_v45 = vmul.f32 %v942_v40, %v942_v40 }
 0x4a3   : > { %v964_v46 = vadd.f32 %v963_v32, %v951_v42  ;;  %v953_v47 = vmul.f32 %v944_v43, %v944_v43 }
 0x4a4   : > { %v956_v48 = vadd.f32 %v955_v44, %v952_v45 }
 0x4a5   : > { %v965_v49 = vadd.f32 %v964_v46, %v953_v47 }
 0x4a6   : > { %v957_v50 = vrot.slane %v956_v48, 4 }
 0x4a7   : > { %v966_v51 = vrot.slane %v965_v49, 4 }
 0x4a8   : > { %v958_v52 = vadd.f32 %v957_v50, %v956_v48 }
 0x4a9   : > { %v967_v53 = vadd.f32 %v966_v51, %v965_v49 }
 0x4aa   : > { %v959_v54 = vrot.slane %v958_v52, 2 }
 0x4ab   : > { %v968_v55 = vrot.slane %v967_v53, 2 }
 0x4ac   : > { %v960_v56 = vadd.f32 %v959_v54, %v958_v52 }
 0x4ad   : > { %v969_v57 = vadd.f32 %v968_v55, %v967_v53 }
 0x4ae   : > { %v961_v58 = vrot.slane %v960_v56, 1 }
 0x4af   : > { %v970_v59 = vrot.slane %v969_v57, 1 }
 0x4b0   : > { %v962_v60 = vadd.f32 %v961_v58, %v960_v56 }
 0x4b1   : > { %v971_v61 = vadd.f32 %v970_v59, %v969_v57 }
 0x4b2   : > { %v972_v62 = vmax.f32 %v962_v60, 1e-24 }
 0x4b3   : > { %v973_v63 = vmax.f32 %v971_v61, 1e-24 }
 0x4b4   : > { %1224 = vrsqrt.f32 %v972_v62 }
 0x4b5   : > { %1226 = vrsqrt.f32 %v973_v63 }
 0x4be   : > { %v1225_v1 = vpop.eup %1224 }
 0x4bf   : > { %v1227_v2 = vpop.eup %1226  ;;  %v982_v3 = vmul.f32 %v1225_v1, %v942_v40  ;;  %v976_v4 = vmul.f32 %v1225_v1, %v928_v18  ;;  %v978_v5 = vmul.f32 %v1225_v1, %v932_v23  ;;  %v980_v6 = vmul.f32 %v1225_v1, %v938_v34 }
 0x4c0   : > { %v983_v7 = vmul.f32 %v1227_v2, %v944_v43  ;;  %v977_v8 = vmul.f32 %v1227_v2, %v930_v21  ;;  %v979_v9 = vmul.f32 %v1227_v2, %v934_v25  ;;  %v981_v10 = vmul.f32 %v1227_v2, %v940_v37 }
 0x4c1   : > { %990 = vst [vmem:[%s418_s28 + $0x30] sm:$0xff] %v982_v3  ;;  %984 = vst [vmem:[%s418_s28] sm:$0xff] %v976_v4 }
 0x4c2   : > { %986 = vst [vmem:[%s418_s28 + $0x10] sm:$0xff] %v978_v5  ;;  %988 = vst [vmem:[%s418_s28 + $0x20] sm:$0xff] %v980_v6 }
 0x4c3   : > { %991 = vst [vmem:[%s418_s28 + $0x38] sm:$0xff] %v983_v7  ;;  %985 = vst [vmem:[%s418_s28 + $0x8] sm:$0xff] %v977_v8 }
 0x4c4   : > { %987 = vst [vmem:[%s418_s28 + $0x18] sm:$0xff] %v979_v9  ;;  %989 = vst [vmem:[%s418_s28 + $0x28] sm:$0xff] %v981_v10 }
 0x4c5   : > { %1269 = shalt.err (!%p1266_p9)
}
 0x4c6   : > { %s1270_s28 = scalar_lea.hbm %s1597_s20, 1024  ;;  %s1274_s18 = scalar_lea.hbm %s1653_s12, 2048 }
 0x4c7   : > { %p1271_p10 = scmp.ne.s32.totalorder %s1597_s20, %s1270_s28  ;;  %p1275_p13 = scmp.lt.u32.totalorder %s1597_s20, %s1653_s12 }
 0x4c8   : > { %p1276_p0 = scmp.lt.u32.totalorder %s1274_s18, %s1270_s28  ;;  %p1278_p2 = scmp.lt.u32.totalorder %s1270_s28, %s1597_s20 }
 0x4c9   : > { %p1272_p11 = pnand %p1271_p10, %p1436_p5 }
 0x4ca   : > { %p1277_p1 = por %p1276_p0, %p1275_p13 }
 0x4cb   : > { %p1273_p12 = pneg %p1272_p11 }
 0x4cc   : > { %p1279_p3 = por %p1278_p2, %p1277_p1 }
 0x4ce   : > { %p1280_p4 = pnand %p1279_p3, %p1273_p12 }
 0x4d0   : > { %1283 = shalt.err (!%p1280_p4)
}
 0x4d1   : > { %s1331_s26 = smov 512   ;;  %s1332_s0 = smov 16  }
 0x4d2   : > { %1162 = dma.vmem_to_hbm [thread:$0]  (%p1436_p5), %s1592_s23, 1024, %s1597_s20, %s998_s25, %s1328_s17, %s1331_s26, %s1332_s0  }
 0x4d3 PF: > { %p1172_p7 = scmp.ge.s32.totalorder %s1322_s24, 2  ;;  %s1042_s30 = sand.u32 1, %s1310_s21  }
 0x4d4   : > { %s1043_s28 = scalar_lea.sflag [#allocation3], %s1042_s30 }
 0x4d5   : > { %p1166_p8 = pnand %p1172_p7, %p1440_p6 }
 0x4d7   : > { %1301 = dma.done.wait (!%p1166_p8), %s1043_s28, 256  }
 0x4d8   : > { %1303 = vsyncadd (!%p1166_p8), %s1043_s28, 4294967040  ;;  %s1052_s16 = scalar_lea.sflag [#allocation5], %s1042_s30 }
 0x4d9   : > { %1305 = dma.done.wait (!%p1166_p8), %s1052_s16, 1024  }
 0x4da   : > { %1307 = vsyncadd (!%p1166_p8), %s1052_s16, 4294966272  ;;  %s1662_s13 = sld [smem:[#allocation8_spill]]  ;;  %s1663_s23 = sld [smem:[#allocation9_spill]] }
 0x4db   : > { %p26_p5 = scmp.ge.s32.totalorder %s1423_s27, 4   ;;  %s1664_s21 = smov %s1314_s22 }
 0x4dc   : > { %s1666_s24 = smov %s1423_s27 }
 0x4dd   :  { %28 = sbr.rel (!%p26_p5) target bundleno = 7 (0x7), region = 116 }
 0x4e0   : > { %s1665_s22 = smov %s1662_s13 }
 0x4e4   :  { %1057 = vsyncpa [#allocation3], 1 }
 0x4e5   :  { %1059 = vsyncpa [#allocation3 + $0x1], 1 }
 0x4e6   :  { %1060 = vsyncpa [#allocation5], 1 }
 0x4e7   :  { %1062 = vsyncpa [#allocation5 + $0x1], 1 }

</bundles_post_ra>
